<compile_context>
chip_gen: v6e
topology: v6e:2x2x1
jax: 0.10.0
libtpu: 0.0.40
codegen_flags: <defaults>
</compile_context>

<pallas_src>
import functools

import jax
import jax.numpy as jnp
from jax.experimental import pallas as pl
from jax.experimental.pallas import tpu as pltpu

_LANE = 128
_SUBLANE = 8


def _dqn_kernel(x_ref, w1_ref, b1_ref, w2_ref, b2_ref, w3_ref, b3_ref, o_ref):
    # Layer 1: (TB, in) @ (in, 64) + (1, 64) -> tanh   (f32 accumulate)
    h1 = jnp.tanh(
        jnp.dot(x_ref[...], w1_ref[...], preferred_element_type=jnp.float32)
        + b1_ref[...]
    )
    # Layer 2: (TB, 64) @ (64, 128) + (1, 128) -> tanh
    h2 = jnp.tanh(
        jnp.dot(h1.astype(w2_ref.dtype), w2_ref[...],
                preferred_element_type=jnp.float32)
        + b2_ref[...]
    )
    # Layer 3: (TB, 128) @ (128, out_pad) + (1, out_pad)
    o_ref[...] = (
        jnp.dot(h2.astype(w3_ref.dtype), w3_ref[...],
                preferred_element_type=jnp.float32)
        + b3_ref[...]
    ).astype(o_ref.dtype)


def _round_up(x, m):
    return ((x + m - 1) // m) * m


def dqn_forward(x, params, *, block_batch=1024, use_bf16=False):
    """Fused forward pass of the DQN MLP on TPU via Pallas.

    x: (B, input_size) float32
    params: dict with w1 (in,64), b1 (1,64), w2 (64,128), b2 (1,128),
            w3 (128,out), b3 (1,out)   -- all float32
    """
    w1, b1 = params["w1"], params["b1"]
    w2, b2 = params["w2"], params["b2"]
    w3, b3 = params["w3"], params["b3"]
    B, F = x.shape
    h1_dim, h2_dim = w1.shape[1], w2.shape[1]
    out_size = w3.shape[1]

    # --- lane-dense output: pad the last-layer columns to a multiple of 128 ---
    out_pad = _round_up(max(out_size, _LANE), _LANE)
    if out_pad != out_size:
        w3p = jnp.zeros((w3.shape[0], out_pad), w3.dtype).at[:, :out_size].set(w3)
        b3p = jnp.zeros((1, out_pad), b3.dtype).at[:, :out_size].set(b3)
    else:
        w3p, b3p = w3, b3

    # --- optional bf16 matmul operands (f32 accumulation kept in-kernel) ---
    if use_bf16:
        xc = x.astype(jnp.bfloat16)
        w1c, w2c, w3c = (w.astype(jnp.bfloat16) for w in (w1, w2, w3p))
    else:
        xc, w1c, w2c, w3c = x, w1, w2, w3p

    # --- batch tiling: sublane-aligned tile, pad B to a multiple of it -------
    TB = min(block_batch, max(_SUBLANE, _round_up(B, _SUBLANE)))
    TB = _round_up(TB, _SUBLANE)
    Bp = _round_up(B, TB)
    if Bp != B:
        xc = jnp.zeros((Bp, F), xc.dtype).at[:B].set(xc)

    grid = (pl.cdiv(Bp, TB),)

    # --- cost estimate (helps XLA schedule the custom call) ------------------
    flops = 2 * Bp * (F * h1_dim + h1_dim * h2_dim + h2_dim * out_pad)
    transcendentals = Bp * (h1_dim + h2_dim)
    bytes_accessed = (
        Bp * F * xc.dtype.itemsize
        + Bp * out_pad * 4
        + w1c.size * w1c.dtype.itemsize + b1.size * 4
        + w2c.size * w2c.dtype.itemsize + b2.size * 4
        + w3c.size * w3c.dtype.itemsize + b3p.size * 4
    )

    def resident(a):
        # Weight/bias block: full array, constant index -> stays in VMEM across steps.
        return pl.BlockSpec(a.shape, lambda i: (0,) * a.ndim,
                            memory_space=pltpu.VMEM)

    out = pl.pallas_call(
        _dqn_kernel,
        out_shape=jax.ShapeDtypeStruct((Bp, out_pad), jnp.float32),
        grid=grid,
        in_specs=[
            pl.BlockSpec((TB, F), lambda i: (i, 0), memory_space=pltpu.VMEM),
            resident(w1c), resident(b1),
            resident(w2c), resident(b2),
            resident(w3c), resident(b3p),
        ],
        out_specs=pl.BlockSpec((TB, out_pad), lambda i: (i, 0),
                               memory_space=pltpu.VMEM),
        compiler_params=pltpu.CompilerParams(
            dimension_semantics=("parallel",),      # megacore sharding on v7x
            vmem_limit_bytes=32 * 1024 * 1024,      # tiny tiles; safe on v5e/v6e/v7x
        ),
        cost_estimate=pl.CostEstimate(
            flops=flops,
            transcendentals=transcendentals,
            bytes_accessed=bytes_accessed,
        ),
    )(xc, w1c, b1, w2c, b2, w3c, b3p)

    # Slice off batch padding and the lane padding of the last layer.
    return out[:B, :out_size]


def init_dqn_params(key, input_size, output_size):
    """Deterministic init mimicking PyTorch nn.Linear defaults
    (uniform(-1/sqrt(fan_in), 1/sqrt(fan_in)))."""
    def linear(k, fan_in, fan_out):
        kw, kb = jax.random.split(k)
        bound = 1.0 / jnp.sqrt(jnp.float32(fan_in))
        # stored as (in, out): transposed relative to PyTorch's (out, in)
        w = jax.random.uniform(kw, (fan_in, fan_out), jnp.float32, -bound, bound)
        b = jax.random.uniform(kb, (1, fan_out), jnp.float32, -bound, bound)
        return w, b

    k1, k2, k3 = jax.random.split(key, 3)
    w1, b1 = linear(k1, input_size, 64)
    w2, b2 = linear(k2, 64, 128)
    w3, b3 = linear(k3, 128, output_size)
    return {"w1": w1, "b1": b1, "w2": w2, "b2": b2, "w3": w3, "b3": b3}


def dqn_reference(x, p):
    """Pure-JAX reference for correctness check."""
    h1 = jnp.tanh(x @ p["w1"] + p["b1"])
    h2 = jnp.tanh(h1 @ p["w2"] + p["b2"])
    return h2 @ p["w3"] + p["b3"]


if __name__ == "__main__":
    key = jax.random.PRNGKey(0)
    k_params, k_x1, k_x2 = jax.random.split(key, 3)

    input_size = 32
    output_size = 8
    params = init_dqn_params(k_params, input_size, output_size)

    # 1) Small batch, single tile, f32 path.
    batch = 8
    x = jax.random.normal(k_x1, (batch, input_size), jnp.float32)
    out = jax.block_until_ready(dqn_forward(x, params))
    ref = dqn_reference(x, params)
    assert out.shape == (batch, output_size)
    assert jnp.allclose(out, ref, atol=1e-5, rtol=1e-5), "f32 mismatch vs reference"

    # 2) Ragged batch, multi-tile grid (exercises batch padding + pipelining).
    batch2 = 100
    x2 = jax.random.normal(k_x2, (batch2, input_size), jnp.float32)
    out2 = jax.block_until_ready(dqn_forward(x2, params, block_batch=32))
    ref2 = dqn_reference(x2, params)
    assert out2.shape == (batch2, output_size)
    assert jnp.allclose(out2, ref2, atol=1e-5, rtol=1e-5), "tiled mismatch vs reference"

    # 3) bf16 matmul operands (bandwidth / MXU win on v6e/v7x), loose tolerance.
    out3 = jax.block_until_ready(dqn_forward(x2, params, block_batch=32, use_bf16=True))
    assert jnp.allclose(out3, ref2, atol=2e-2, rtol=2e-2), "bf16 mismatch vs reference"

    print("KERNEL_OK")
</pallas_src>

<mosaic_0001>
module attributes {stable_mosaic.version = 11 : i64} {
  func.func @_dqn_kernel(%arg0: i32, %arg1: memref<8x32xf32, #tpu.memory_space<vmem>>, %arg2: memref<32x64xf32, #tpu.memory_space<vmem>>, %arg3: memref<1x64xf32, #tpu.memory_space<vmem>>, %arg4: memref<64x128xf32, #tpu.memory_space<vmem>>, %arg5: memref<1x128xf32, #tpu.memory_space<vmem>>, %arg6: memref<128x128xf32, #tpu.memory_space<vmem>>, %arg7: memref<1x128xf32, #tpu.memory_space<vmem>>, %arg8: memref<8x128xf32, #tpu.memory_space<vmem>>) attributes {dimension_semantics = [#tpu.dimension_semantics<parallel>], iteration_bounds = array<i64: 1>, scalar_prefetch = 0 : i64, scratch_operands = 0 : i64, tpu.core_type = #tpu.core_type<tc>, window_params = [{transform_indices = @transform_0, window_bounds = array<i64: 8, 32>}, {pipeline_mode = #tpu.pipeline_mode<synchronous>, transform_indices = @transform_1, window_bounds = array<i64: 32, 64>}, {pipeline_mode = #tpu.pipeline_mode<synchronous>, transform_indices = @transform_2, window_bounds = array<i64: 1, 64>}, {pipeline_mode = #tpu.pipeline_mode<synchronous>, transform_indices = @transform_3, window_bounds = array<i64: 64, 128>}, {pipeline_mode = #tpu.pipeline_mode<synchronous>, transform_indices = @transform_4, window_bounds = array<i64: 1, 128>}, {pipeline_mode = #tpu.pipeline_mode<synchronous>, transform_indices = @transform_5, window_bounds = array<i64: 128, 128>}, {pipeline_mode = #tpu.pipeline_mode<synchronous>, transform_indices = @transform_6, window_bounds = array<i64: 1, 128>}, {transform_indices = @transform_7, window_bounds = array<i64: 8, 128>}]} {
    %c0 = arith.constant 0 : index
    %c0_0 = arith.constant 0 : index
    %0 = vector.load %arg1[%c0, %c0_0] : memref<8x32xf32, #tpu.memory_space<vmem>>, vector<8x32xf32>
    %c0_1 = arith.constant 0 : index
    %c0_2 = arith.constant 0 : index
    %1 = vector.load %arg2[%c0_1, %c0_2] : memref<32x64xf32, #tpu.memory_space<vmem>>, vector<32x64xf32>
    %cst = arith.constant dense<0.000000e+00> : vector<8x64xf32>
    %2 = tpu.matmul %0, %1, %cst {dimension_numbers = #tpu.dot_dimension_numbers<[1], [0], [0], [1], [0, 0, 1, 1], [], []>} : vector<8x32xf32>, vector<32x64xf32>, vector<8x64xf32> -> vector<8x64xf32>
    %c0_3 = arith.constant 0 : index
    %c0_4 = arith.constant 0 : index
    %3 = vector.load %arg3[%c0_3, %c0_4] : memref<1x64xf32, #tpu.memory_space<vmem>>, vector<1x64xf32>
    %4 = vector.broadcast %3 : vector<1x64xf32> to vector<8x64xf32>
    %5 = arith.addf %2, %4 : vector<8x64xf32>
    %6 = math.tanh %5 : vector<8x64xf32>
    %c0_5 = arith.constant 0 : index
    %c0_6 = arith.constant 0 : index
    %7 = vector.load %arg4[%c0_5, %c0_6] : memref<64x128xf32, #tpu.memory_space<vmem>>, vector<64x128xf32>
    %cst_7 = arith.constant dense<0.000000e+00> : vector<8x128xf32>
    %8 = tpu.matmul %6, %7, %cst_7 {dimension_numbers = #tpu.dot_dimension_numbers<[1], [0], [0], [1], [0, 0, 1, 1], [], []>} : vector<8x64xf32>, vector<64x128xf32>, vector<8x128xf32> -> vector<8x128xf32>
    %c0_8 = arith.constant 0 : index
    %c0_9 = arith.constant 0 : index
    %9 = vector.load %arg5[%c0_8, %c0_9] : memref<1x128xf32, #tpu.memory_space<vmem>>, vector<1x128xf32>
    %10 = vector.broadcast %9 : vector<1x128xf32> to vector<8x128xf32>
    %11 = arith.addf %8, %10 : vector<8x128xf32>
    %12 = math.tanh %11 : vector<8x128xf32>
    %c0_10 = arith.constant 0 : index
    %c0_11 = arith.constant 0 : index
    %13 = vector.load %arg6[%c0_10, %c0_11] : memref<128x128xf32, #tpu.memory_space<vmem>>, vector<128x128xf32>
    %cst_12 = arith.constant dense<0.000000e+00> : vector<8x128xf32>
    %14 = tpu.matmul %12, %13, %cst_12 {dimension_numbers = #tpu.dot_dimension_numbers<[1], [0], [0], [1], [0, 0, 1, 1], [], []>} : vector<8x128xf32>, vector<128x128xf32>, vector<8x128xf32> -> vector<8x128xf32>
    %c0_13 = arith.constant 0 : index
    %c0_14 = arith.constant 0 : index
    %15 = vector.load %arg7[%c0_13, %c0_14] : memref<1x128xf32, #tpu.memory_space<vmem>>, vector<1x128xf32>
    %16 = vector.broadcast %15 : vector<1x128xf32> to vector<8x128xf32>
    %17 = arith.addf %14, %16 : vector<8x128xf32>
    %c0_15 = arith.constant 0 : index
    %c0_16 = arith.constant 0 : index
    %18 = vector.load %arg8[%c0_15, %c0_16] : memref<8x128xf32, #tpu.memory_space<vmem>>, vector<8x128xf32>
    tpu.vector_store %arg8[%c0_15, %c0_16], %17 {strides = array<i32>} : memref<8x128xf32, #tpu.memory_space<vmem>>, vector<8x128xf32>,
    return
  }
  func.func @transform_0(%arg0: i32) -> (i32, i32) {
    %c0_i32 = arith.constant 0 : i32
    %c0_i32_0 = arith.constant 0 : i32
    return %arg0, %c0_i32 : i32, i32
  }
  func.func @transform_1(%arg0: i32) -> (i32, i32) {
    %c0_i32 = arith.constant 0 : i32
    %c0_i32_0 = arith.constant 0 : i32
    %c0_i32_1 = arith.constant 0 : i32
    return %c0_i32, %c0_i32_0 : i32, i32
  }
  func.func @transform_2(%arg0: i32) -> (i32, i32) {
    %c0_i32 = arith.constant 0 : i32
    %c0_i32_0 = arith.constant 0 : i32
    %c0_i32_1 = arith.constant 0 : i32
    return %c0_i32, %c0_i32_0 : i32, i32
  }
  func.func @transform_3(%arg0: i32) -> (i32, i32) {
    %c0_i32 = arith.constant 0 : i32
    %c0_i32_0 = arith.constant 0 : i32
    %c0_i32_1 = arith.constant 0 : i32
    return %c0_i32, %c0_i32_0 : i32, i32
  }
  func.func @transform_4(%arg0: i32) -> (i32, i32) {
    %c0_i32 = arith.constant 0 : i32
    %c0_i32_0 = arith.constant 0 : i32
    %c0_i32_1 = arith.constant 0 : i32
    return %c0_i32, %c0_i32_0 : i32, i32
  }
  func.func @transform_5(%arg0: i32) -> (i32, i32) {
    %c0_i32 = arith.constant 0 : i32
    %c0_i32_0 = arith.constant 0 : i32
    %c0_i32_1 = arith.constant 0 : i32
    return %c0_i32, %c0_i32_0 : i32, i32
  }
  func.func @transform_6(%arg0: i32) -> (i32, i32) {
    %c0_i32 = arith.constant 0 : i32
    %c0_i32_0 = arith.constant 0 : i32
    %c0_i32_1 = arith.constant 0 : i32
    return %c0_i32, %c0_i32_0 : i32, i32
  }
  func.func @transform_7(%arg0: i32) -> (i32, i32) {
    %c0_i32 = arith.constant 0 : i32
    %c0_i32_0 = arith.constant 0 : i32
    return %arg0, %c0_i32 : i32, i32
  }
}

</mosaic_0001>

<bundles_post_ra>
// kernel: tpu_custom_call.1
= control target key start
LH: loop header
LB: loop body
LE: loop exit
PB: predicated region body
PF: predicated region fallthrough
CT: control target
= control target key end

     0   :  { %12 = vsyncpa [#allocation3], 0  ;;  %s706_s0 = inlined_call_operand.hbm [shape: f32[8,32], index: 0, kind: input, shape index: {}]   ;;  %s707_s1 = inlined_call_operand.hbm [shape: f32[32,64], index: 1, kind: input, shape index: {}]   ;;  %s708_s2 = inlined_call_operand.vmem [shape: f32[1,64], index: 2, kind: input, shape index: {}]   ;;  %s709_s3 = inlined_call_operand.hbm [shape: f32[64,128], index: 3, kind: input, shape index: {}]   ;;  %s710_s4 = inlined_call_operand.vmem [shape: f32[1,128], index: 4, kind: input, shape index: {}]   ;;  %s711_s5 = inlined_call_operand.hbm [shape: f32[128,128], index: 5, kind: input, shape index: {}]   ;;  %s712_s6 = inlined_call_operand.vmem [shape: f32[1,128], index: 6, kind: input, shape index: {}]   ;;  %s713_s7 = inlined_call_operand.hbm [shape: f32[8,128], index: 7, kind: output, shape index: {}]  }
   0x1   :  { %13 = vsyncpa [#allocation6], 0 }
   0x2   :  { %14 = vsyncpa [#allocation9], 0 }
   0x3   :  { %15 = vsyncpa [#allocation4], 0  ;;  %s590_s24 = smov [#allocation5]  }
   0x4   :  { %s31_s25 = sshll.u32 %s590_s24, 4  ;;  %s32_s25 = int_to_ptr.vmem [resolvable:$true] %s31_s25 }
   0x5   :  { %s490_s26 = scalar_lea.vmem %s32_s25, 512  ;;  %p495_p1 = scmp.lt.s32.totalorder %s32_s25, %s32_s25 }
   0x6   :  { %p491_p0 = scmp.ne.s32.totalorder %s32_s25, %s490_s26  ;;  %p496_p2 = scmp.lt.s32.totalorder %s490_s26, %s490_s26 }
   0x8   :  { %p497_p3 = por %p496_p2, %p495_p1 }
   0xa   :  { %p498_p4 = pnand %p497_p3, %p491_p0 }
   0xc   :  { %501 = shalt.err (!%p498_p4)
}
   0xd   :  { %s591_s27 = smov 128   ;;  %s592_s28 = smov 8  }
   0xe   :  { %37 = dma.hbm_to_vmem [thread:$0]  %s707_s1, 512, %s32_s25, [#allocation6], %s591_s27, %s591_s27, %s592_s28  }
   0xf   :  { %s593_s8 = smov [#allocation2]   ;;  %s594_s10 = smov [#allocation7]  }
  0x10   :  { %s22_s9 = sshll.u32 %s593_s8, 4  ;;  %s45_s11 = sshll.u32 %s594_s10, 4  ;;  %s23_s9 = int_to_ptr.vmem [resolvable:$true] %s22_s9  ;;  %s46_s11 = int_to_ptr.vmem [resolvable:$true] %s45_s11 }
  0x11   :  { %s510_s12 = scalar_lea.vmem %s23_s9, 128  ;;  %p515_p6 = scmp.lt.s32.totalorder %s23_s9, %s23_s9 }
  0x12   :  { %p511_p5 = scmp.ne.s32.totalorder %s23_s9, %s510_s12  ;;  %p516_p7 = scmp.lt.s32.totalorder %s510_s12, %s510_s12 }
  0x14   :  { %p517_p8 = por %p516_p7, %p515_p6 }
  0x16   :  { %p518_p9 = pnand %p517_p8, %p511_p5 }
  0x18   :  { %521 = shalt.err (!%p518_p9)
}
  0x19   :  { %25 = dma.hbm_to_vmem [thread:$0]  %s706_s0, 128, %s23_s9, [#allocation3]  }
  0x1a   :  { %s530_s15 = scalar_lea.vmem %s46_s11, 1024  ;;  %p535_p11 = scmp.lt.s32.totalorder %s46_s11, %s46_s11 }
  0x1b   :  { %p531_p10 = scmp.ne.s32.totalorder %s46_s11, %s530_s15  ;;  %p536_p12 = scmp.lt.s32.totalorder %s530_s15, %s530_s15 }
  0x1d   :  { %p537_p13 = por %p536_p12, %p535_p11 }
  0x1f   :  { %p538_p0 = pnand %p537_p13, %p531_p10 }
  0x21   :  { %541 = shalt.err (!%p538_p0)
}
  0x22   :  { %51 = dma.hbm_to_vmem [thread:$0]  %s709_s3, 1024, %s46_s11, [#allocation6], %s591_s27, %s591_s27, %s592_s28  }
  0x23   :  { %s595_s17 = smov [#allocation8]  }
  0x24   :  { %s59_s18 = sshll.u32 %s595_s17, 4  ;;  %s60_s18 = int_to_ptr.vmem [resolvable:$true] %s59_s18 }
  0x25   :  { %s550_s19 = scalar_lea.vmem %s60_s18, 2048  ;;  %p555_p2 = scmp.lt.s32.totalorder %s60_s18, %s60_s18 }
  0x26   :  { %p551_p1 = scmp.ne.s32.totalorder %s60_s18, %s550_s19  ;;  %p556_p3 = scmp.lt.s32.totalorder %s550_s19, %s550_s19 }
  0x28   :  { %p557_p4 = por %p556_p3, %p555_p2 }
  0x2a   :  { %p558_p5 = pnand %p557_p4, %p551_p1 }
  0x2c   :  { %561 = shalt.err (!%p558_p5)
}
  0x2d   :  { %65 = dma.hbm_to_vmem [thread:$0]  %s711_s5, 2048, %s60_s18, [#allocation9], %s591_s27, %s591_s27, %s592_s28  }
  0x2e   :  { %582 = dma.done.wait [#allocation3], 128  }
  0x2f   :  { %583 = vsyncadd [#allocation3], 4294967168 }
  0x30   :  { %584 = dma.done.wait [#allocation6], 1536  }
  0x31   :  { %585 = vsyncadd [#allocation6], 4294965760 }
  0x32   :  { %586 = dma.done.wait [#allocation9], 2048  }
  0x33   :  { %587 = vsyncadd [#allocation9], 4294965248  ;;  %v596_v0 = vmov 0.0   ;;  %vm597_vm0 = vmmov 0   ;;  %v84_v1 = vld [vmem:[#allocation5 + $0x18] sm:$0xff]  ;;  %v83_v2 = vld [vmem:[#allocation5 + $0x10] sm:$0xff] }
  0x34   :  { %404 = vmatprep.subr.mxu1 %v596_v0  ;;  %412 = vmatprep.mubr.msk.f32.mxu1 %vm597_vm0, %v596_v0  ;;  %v82_v3 = vld [vmem:[#allocation5 + $0x8] sm:$0xff]  ;;  %v81_v4 = vld [vmem:[#allocation5] sm:$0xff]  ;;  %v80_v5 = vld [vmem:[#allocation2] sm:$0xff]  ;;  %vm92_vm1 = vcmask 261120   ;;  %vm182_vm2 = vcmask 523264   ;;  %s598_s24 = smov [#allocation10]  }
  0x35   :  { %434 = vmatprep.subr.mxu0 %v596_v0  ;;  %466 = vmatprep.mubr.msk.f32.mxu0 %vm597_vm0, %v596_v0  ;;  %v174_v6 = vld [vmem:[#allocation7 + $0x38] sm:$0xff]  ;;  %v173_v7 = vld [vmem:[#allocation7 + $0x30] sm:$0xff]  ;;  %v172_v8 = vld [vmem:[#allocation7 + $0x28] sm:$0xff]  ;;  %s357_s25 = sshll.u32 %s598_s24, 4  ;;  %s358_s25 = int_to_ptr.vmem [resolvable:$true] %s357_s25 }
  0x36   :  { %405 = vmatpush3.msra.mxu1 %v84_v1  ;;  %v171_v9 = vld [vmem:[#allocation7 + $0x20] sm:$0xff]  ;;  %v170_v10 = vld [vmem:[#allocation7 + $0x18] sm:$0xff]  ;;  %v169_v11 = vld [vmem:[#allocation7 + $0x10] sm:$0xff]  ;;  %s562_s26 = scalar_lea.vmem %s358_s25, 128  ;;  %p567_p7 = scmp.lt.s32.totalorder %s358_s25, %s358_s25 }
  0x37   :  { %406 = vmatprep.subr.mxu1 %v596_v0  ;;  %v168_v12 = vld [vmem:[#allocation7 + $0x8] sm:$0xff]  ;;  %v167_v13 = vld [vmem:[#allocation7] sm:$0xff]  ;;  %v272_v14 = vld [vmem:[#allocation8 + $0x78] sm:$0xff]  ;;  %p563_p6 = scmp.ne.s32.totalorder %s358_s25, %s562_s26  ;;  %p568_p8 = scmp.lt.s32.totalorder %s562_s26, %s562_s26 }
  0x38   :  { %407 = vmatpush3.msra.mxu1 %v83_v2  ;;  %v271_v15 = vld [vmem:[#allocation8 + $0x70] sm:$0xff]  ;;  %435 = vmatpush3.msra.mxu0 %v272_v14  ;;  %v270_v16 = vld [vmem:[#allocation8 + $0x68] sm:$0xff]  ;;  %v269_v17 = vld [vmem:[#allocation8 + $0x60] sm:$0xff] }
  0x39   :  { %408 = vmatprep.subr.mxu1 %v596_v0  ;;  %436 = vmatprep.subr.mxu0 %v596_v0  ;;  %v268_v18 = vld [vmem:[#allocation8 + $0x58] sm:$0xff]  ;;  %v267_v19 = vld [vmem:[#allocation8 + $0x50] sm:$0xff]  ;;  %v266_v20 = vld [vmem:[#allocation8 + $0x48] sm:$0xff]  ;;  %p569_p9 = por %p568_p8, %p567_p7 }
  0x3a   :  { %409 = vmatpush3.msra.mxu1 %v82_v3  ;;  %437 = vmatpush3.msra.mxu0 %v271_v15  ;;  %v368_v21 = vld [vmem:[%s708_s2] ss:$0 sm:$0xff]  ;;  %v265_v26 = vld [vmem:[#allocation8 + $0x40] sm:$0xff]  ;;  %v263_v28 = vld [vmem:[#allocation8 + $0x30] sm:$0xff] }
  0x3b   :  { %410 = vmatprep.subr.mxu1 %v596_v0  ;;  %438 = vmatprep.subr.mxu0 %v596_v0  ;;  %v264_v27 = vld [vmem:[#allocation8 + $0x38] sm:$0xff]  ;;  %v262_v29 = vld [vmem:[#allocation8 + $0x28] sm:$0xff]  ;;  %v261_v30 = vld [vmem:[#allocation8 + $0x20] sm:$0xff]  ;;  %p570_p10 = pnand %p569_p9, %p563_p6 }
  0x3c   :  { %411 = vmatpush3.msra.mxu1 %v81_v4  ;;  %439 = vmatpush3.msra.mxu0 %v270_v16  ;;  %v260_v31 = vld [vmem:[#allocation8 + $0x18] sm:$0xff]  ;;  %v259_v32 = vld [vmem:[#allocation8 + $0x10] sm:$0xff]  ;;  %v258_v33 = vld [vmem:[#allocation8 + $0x8] sm:$0xff] }
  0x3d   :  { %413 = vmatmul.mubr.msk.f32.vlgmr.msra.gmra.mxu1 %vm92_vm1, %v80_v5  ;;  %415 = vmatprep.subr.mxu1 %v596_v0  ;;  %v257_v34 = vld [vmem:[#allocation8] sm:$0xff]  ;;  %v370_v35 = vld [vmem:[%s710_s4] ss:$0 sm:$0xff] }
  0x3e   :  { %431 = vmatprep.mubr.msk.f32.mxu1 %vm597_vm0, %v596_v0  ;;  %416 = vmatpush3.msra.mxu1 %v174_v6  ;;  %v372_v40 = vld [vmem:[%s712_s6] ss:$0 sm:$0xff] }
  0x3f   :  { %417 = vmatprep.subr.mxu1 %v596_v0  ;;  %440 = vmatprep.subr.mxu0 %v596_v0 }
  0x40   :  { %418 = vmatpush3.msra.mxu1 %v173_v7  ;;  %441 = vmatpush3.msra.mxu0 %v269_v17 }
  0x41   :  { %419 = vmatprep.subr.mxu1 %v596_v0  ;;  %442 = vmatprep.subr.mxu0 %v596_v0 }
  0x42   :  { %420 = vmatpush3.msra.mxu1 %v172_v8  ;;  %443 = vmatpush3.msra.mxu0 %v268_v18 }
  0x43   :  { %421 = vmatprep.subr.mxu1 %v596_v0  ;;  %444 = vmatprep.subr.mxu0 %v596_v0 }
  0x44   :  { %422 = vmatpush3.msra.mxu1 %v171_v9  ;;  %445 = vmatpush3.msra.mxu0 %v267_v19 }
  0x45   :  { %423 = vmatprep.subr.mxu1 %v596_v0  ;;  %446 = vmatprep.subr.mxu0 %v596_v0 }
  0x46   :  { %424 = vmatpush3.msra.mxu1 %v170_v10  ;;  %447 = vmatpush3.msra.mxu0 %v266_v20 }
  0x47   :  { %425 = vmatprep.subr.mxu1 %v596_v0  ;;  %448 = vmatprep.subr.mxu0 %v596_v0 }
  0x48   :  { %426 = vmatpush3.msra.mxu1 %v169_v11  ;;  %449 = vmatpush3.msra.mxu0 %v265_v26 }
  0x49   :  { %427 = vmatprep.subr.mxu1 %v596_v0  ;;  %450 = vmatprep.subr.mxu0 %v596_v0 }
  0x4a   :  { %428 = vmatpush3.msra.mxu1 %v168_v12  ;;  %451 = vmatpush3.msra.mxu0 %v264_v27 }
  0x4b   :  { %429 = vmatprep.subr.mxu1 %v596_v0  ;;  %452 = vmatprep.subr.mxu0 %v596_v0 }
  0x4c   :  { %430 = vmatpush3.msra.mxu1 %v167_v13  ;;  %453 = vmatpush3.msra.mxu0 %v263_v28 }
  0x4d   :  { %454 = vmatprep.subr.mxu0 %v596_v0 }
  0x4e   :  { %455 = vmatpush3.msra.mxu0 %v262_v29 }
  0x4f   :  { %456 = vmatprep.subr.mxu0 %v596_v0 }
  0x50   :  { %457 = vmatpush3.msra.mxu0 %v261_v30 }
  0x51   :  { %458 = vmatprep.subr.mxu0 %v596_v0 }
  0x52   :  { %459 = vmatpush3.msra.mxu0 %v260_v31 }
  0x53   :  { %460 = vmatprep.subr.mxu0 %v596_v0 }
  0x54   :  { %461 = vmatpush3.msra.mxu0 %v259_v32 }
  0x55   :  { %462 = vmatprep.subr.mxu0 %v596_v0 }
  0x56   :  { %463 = vmatpush3.msra.mxu0 %v258_v33 }
  0x57   :  { %464 = vmatprep.subr.mxu0 %v596_v0 }
  0x58   :  { %465 = vmatpush3.msra.mxu0 %v257_v34 }
  0xfd   :  { %v162_v22 = vpop.f32.mrf.mxu1 }
  0xfe   :  { %v163_v23 = vadd.f32 %v368_v21, %v162_v22 }
  0xff   :  { %v414_v24 = vpop.f32.mrf.mxu1 }
 0x100   :  { %478 = vtanh.f32 %v163_v23 }
 0x10d   :  { %v479_v25 = vpop.eup %478 }
 0x10e   :  { %432 = vmatmul.mubr.msk.f32.vlgmr.msra.gmra.mxu1 %vm182_vm2, %v479_v25 }
 0x1ce   :  { %v252_v36 = vpop.f32.mrf.mxu1 }
 0x1cf   :  { %v253_v37 = vadd.f32 %v370_v35, %v252_v36 }
 0x1d0   :  { %v433_v38 = vpop.f32.mrf.mxu1 }
 0x1d1   :  { %480 = vtanh.f32 %v253_v37 }
 0x1de   :  { %v481_v39 = vpop.eup %480 }
 0x1df   :  { %467 = vmatmul.mubr.f32.vlgmr.msra.gmra.mxu0 %v481_v39 }
 0x29f   :  { %v346_v41 = vpop.f32.mrf.mxu0 }
 0x2a0   :  { %v347_v42 = vadd.f32 %v372_v40, %v346_v41 }
 0x2a1   :  { %v468_v43 = vpop.f32.mrf.mxu0 }
 0x2a2   :  { %350 = vst [vmem:[#allocation10] sm:$0xff] %v347_v42 }
 0x2a3   :  { %573 = shalt.err (!%p570_p10)
}
 0x2a4   :  { %360 = dma.vmem_to_hbm [thread:$0]  %s358_s25, 128, %s713_s7, [#allocation4]  }
 0x2a5   :  { %588 = dma.done.wait [#allocation4], 128  }
 0x2a6   :  { %589 = vsyncadd [#allocation4], 4294967168 }
 0x2a7   :  { %364 = vsyncpa [#allocation3], 1 }
 0x2a8   :  { %365 = vsyncpa [#allocation6], 1 }
 0x2a9   :  { %366 = vsyncpa [#allocation9], 1 }
 0x2aa   :  { %367 = vsyncpa [#allocation4], 1 }

</bundles_post_ra>
